<compile_context>
chip_gen: v7x
topology: tpu7x:2x2x1
jax: 0.10.0
libtpu: 0.0.40
codegen_flags: <defaults>
</compile_context>

<pallas_src>
import jax
import jax.numpy as jnp
from jax.experimental import pallas as pl
from jax.experimental.pallas import tpu as pltpu


def _round_up(x, m):
    return ((x + m - 1) // m) * m


def _vmem_info():
    """(usable tile budget, physical capacity) in bytes, generation-aware."""
    try:
        cap = int(pltpu.get_tpu_info().vmem_capacity_bytes)
    except Exception:
        cap = 64 * 1024 * 1024          # conservative: v7x per-TensorCore VMEM
    # Leave headroom for Mosaic internal scratch:
    #   ~38 MiB budget on v7x (64 MiB phys), ~77 MiB on v5e / v6e (128 MiB).
    return int(cap * 0.6), cap


def _tile_vmem_bytes(bb, bn, C, itemsize):
    """Conservative VMEM estimate for one tile configuration."""
    lane = 128
    return (2 * bb * C * itemsize            # feats tile (double buffered)
            + 2 * C * bn * itemsize          # support^T tile (double buffered)
            + 2 * bb * lane * 4              # labels column tile (lane-padded)
            + 2 * 8 * bn * 4                 # labels_s row tile (sublane-padded)
            + 4 * bb * bn * 4                # sim / e / pos_tile / neg_tile (f32)
            + 2 * bb * lane * 4              # lane-wide pos/neg accumulators
            + 2 * bb * lane * 4)             # output tile (lane-padded)


# ----------------------------------------------------------------------------
# Kernels
# ----------------------------------------------------------------------------
def _lp_intra_resident_kernel(inv_temp, pad_neg):
    """Single-pass kernel: the whole (C, ns_pad) support^T stays resident in
    VMEM.  Padded support columns carry sentinel labels and contribute exactly
    exp(0)=1 each to neg; the static `pad_neg` correction removes them."""

    def kernel(feats_ref, feats_sT_ref, labels_ref, labels_s_ref, out_ref):
        sim = jax.lax.dot_general(
            feats_ref[...], feats_sT_ref[...],
            dimension_numbers=(((1,), (0,)), ((), ())),
            preferred_element_type=jnp.float32,
        ) * inv_temp                                       # (bb, ns_pad) f32
        e = jnp.exp(sim)
        match = labels_ref[...] == labels_s_ref[...]       # (bb,1)==(1,ns)->(bb,ns)
        pos = jnp.min(jnp.where(match, e, jnp.inf), axis=-1, keepdims=True)
        neg = (jnp.sum(jnp.where(match, jnp.float32(0.0), e),
                       axis=-1, keepdims=True)
               - jnp.float32(pad_neg))
        out_ref[...] = -jnp.log(pos / (pos + neg + 1e-6) + 1e-6)

    return kernel


def _lp_intra_tiled_kernel(inv_temp, pad_neg):
    """Streaming kernel: support^T tiled along N_s (reduction axis).  Running
    hardest-positive / negative-sum kept lane-wide (bb, 128) so per-step work
    is pure VPU min/add folds; the cross-lane XLU reduce runs only once, in
    the k==last finalize."""

    def kernel(feats_ref, feats_sT_ref, labels_ref, labels_s_ref, out_ref,
               pos_ref, neg_ref):
        k = pl.program_id(1)

        @pl.when(k == 0)
        def _init():
            pos_ref[...] = jnp.full_like(pos_ref, jnp.inf)
            neg_ref[...] = jnp.zeros_like(neg_ref)

        sim = jax.lax.dot_general(
            feats_ref[...], feats_sT_ref[...],
            dimension_numbers=(((1,), (0,)), ((), ())),
            preferred_element_type=jnp.float32,
        ) * inv_temp                                       # (bb, bn) f32
        e = jnp.exp(sim)
        match = labels_ref[...] == labels_s_ref[...]       # (bb, bn) bool

        pos_tile = jnp.where(match, e, jnp.inf)
        neg_tile = jnp.where(match, jnp.float32(0.0), e)

        # Fold bn lanes down to 128 with elementwise ops on static, vreg-
        # aligned 128-wide lane slices (VPU work only, no relayout).
        bn = e.shape[-1]
        p128 = pos_tile[:, 0:128]
        n128 = neg_tile[:, 0:128]
        for j in range(1, bn // 128):
            p128 = jnp.minimum(p128, pos_tile[:, j * 128:(j + 1) * 128])
            n128 = n128 + neg_tile[:, j * 128:(j + 1) * 128]

        pos_ref[...] = jnp.minimum(pos_ref[...], p128)
        neg_ref[...] = neg_ref[...] + n128

        @pl.when(k == pl.num_programs(1) - 1)
        def _finalize():
            p = jnp.min(pos_ref[...], axis=-1, keepdims=True)
            n = (jnp.sum(neg_ref[...], axis=-1, keepdims=True)
                 - jnp.float32(pad_neg))
            out_ref[...] = -jnp.log(p / (p + n + 1e-6) + 1e-6)

    return kernel


# ----------------------------------------------------------------------------
# Wrapper
# ----------------------------------------------------------------------------
def criterion_lp_intra(feats, feats_s, labels, labels_s, *,
                       intra_topk, temp_lp_loss,
                       block_b=None, block_ns=None):
    """Pallas-backed forward of CriterionLP_intra.  Returns a scalar f32 loss.

    Labels must be non-negative integer IDs (sentinel -1 pads labels_s)."""
    B, C = feats.shape
    B_s = feats_s.shape[0]
    C_s = feats_s.shape[-1]
    assert C == C_s, "query / support feature dims must match"
    feats_s_flat = feats_s.reshape(B_s * intra_topk, C_s)
    n_s = feats_s_flat.shape[0]
    assert labels_s.shape[0] == n_s, \
        "labels_s must have one label per flattened support sample"

    itemsize = jnp.dtype(feats.dtype).itemsize
    sublane = max(8, 32 // itemsize)       # f32 -> 8, bf16 -> 16, int8 -> 32
    lane = 128
    ns_full = _round_up(n_s, lane)
    b_cap = _round_up(B, sublane)
    budget, vmem_cap = _vmem_info()
    inv_temp = float(1.0 / temp_lp_loss)

    def _bb_candidates():
        if block_b is not None:
            return [min(_round_up(block_b, sublane), b_cap)]
        cands = [bb for bb in (1024, 512, 256, 128, 64, 32, 16, 8)
                 if bb % sublane == 0]
        return sorted({min(bb, b_cap) for bb in cands}, reverse=True)

    # ------------------ tiling policy (generation / dtype aware) ------------
    force_tiled = (block_ns is not None
                   and _round_up(block_ns, lane) < ns_full)

    resident = False
    chosen_bb, chosen_bn = sublane, lane
    if not force_tiled:
        for bb in _bb_candidates():
            if _tile_vmem_bytes(bb, ns_full, C, itemsize) <= budget:
                resident, chosen_bb, chosen_bn = True, bb, ns_full
                break

    if not resident:
        if block_ns is not None:
            bn_list = [min(_round_up(block_ns, lane), ns_full)]
        else:
            bn_list = sorted({min(bn, ns_full)
                              for bn in (2048, 1024, 512, 256, 128)},
                             reverse=True)
        bb_list = _bb_candidates()
        chosen_bb, chosen_bn = bb_list[-1], bn_list[-1]   # fallback: smallest
        done = False
        for bb in bb_list:            # big bb first: fewest support re-streams
            for bn in bn_list:        # then big bn: fewest grid steps
                if _tile_vmem_bytes(bb, bn, C, itemsize) <= budget:
                    chosen_bb, chosen_bn = bb, bn
                    done = True
                    break
            if done:
                break

    b_pad = _round_up(B, chosen_bb)
    # On the resident path the support matrix is read once regardless of
    # grid_b, so splitting B across >=2 tiles is free and keeps v7x's second
    # TensorCore busy ("parallel" axis is megacore-sharded).
    if resident and block_b is None and b_pad // chosen_bb < 2 \
            and b_pad >= 2 * sublane:
        chosen_bb = _round_up(-(-b_pad // 2), sublane)
        b_pad = _round_up(B, chosen_bb)

    ns_pad = chosen_bn if resident else _round_up(n_s, chosen_bn)
    pad_neg = float(ns_pad - n_s)    # padded support cols contribute exp(0)=1

    # ------------------ pad + pre-transpose (MXU-native operands) -----------
    feats_p = jnp.pad(feats, ((0, b_pad - B), (0, 0)))
    feats_sT = jnp.pad(feats_s_flat.T, ((0, 0), (0, ns_pad - n_s)))  # (C, ns_pad)
    labels_col = jnp.pad(labels.astype(jnp.int32), (0, b_pad - B),
                         constant_values=-2).reshape(b_pad, 1)
    labels_s_row = jnp.pad(labels_s.astype(jnp.int32), (0, ns_pad - n_s),
                           constant_values=-1).reshape(1, ns_pad)

    cost = _tile_vmem_bytes(chosen_bb, chosen_bn, C, itemsize)
    vmem_limit = int(min(int(0.85 * vmem_cap),
                         max(2 * cost, 32 * 1024 * 1024)))

    if resident:
        out = pl.pallas_call(
            _lp_intra_resident_kernel(inv_temp, pad_neg),
            out_shape=jax.ShapeDtypeStruct((b_pad, 1), jnp.float32),
            grid_spec=pltpu.PrefetchScalarGridSpec(
                num_scalar_prefetch=0,
                grid=(b_pad // chosen_bb,),
                in_specs=[
                    pl.BlockSpec((chosen_bb, C), lambda i: (i, 0)),   # feats
                    pl.BlockSpec((C, ns_pad), lambda i: (0, 0)),      # support^T (resident)
                    pl.BlockSpec((chosen_bb, 1), lambda i: (i, 0)),   # labels
                    pl.BlockSpec((1, ns_pad), lambda i: (0, 0)),      # labels_s
                ],
                out_specs=pl.BlockSpec((chosen_bb, 1), lambda i: (i, 0)),
            ),
            compiler_params=pltpu.CompilerParams(
                dimension_semantics=("parallel",),
                vmem_limit_bytes=vmem_limit,
            ),
        )(feats_p, feats_sT, labels_col, labels_s_row)
    else:
        out = pl.pallas_call(
            _lp_intra_tiled_kernel(inv_temp, pad_neg),
            out_shape=jax.ShapeDtypeStruct((b_pad, 1), jnp.float32),
            grid_spec=pltpu.PrefetchScalarGridSpec(
                num_scalar_prefetch=0,
                grid=(b_pad // chosen_bb, ns_pad // chosen_bn),
                in_specs=[
                    pl.BlockSpec((chosen_bb, C), lambda i, k: (i, 0)),     # feats
                    pl.BlockSpec((C, chosen_bn), lambda i, k: (0, k)),     # support^T
                    pl.BlockSpec((chosen_bb, 1), lambda i, k: (i, 0)),     # labels
                    pl.BlockSpec((1, chosen_bn), lambda i, k: (0, k)),     # labels_s
                ],
                out_specs=pl.BlockSpec((chosen_bb, 1), lambda i, k: (i, 0)),
                scratch_shapes=[
                    pltpu.VMEM((chosen_bb, lane), jnp.float32),  # running pos min
                    pltpu.VMEM((chosen_bb, lane), jnp.float32),  # running neg sum
                ],
            ),
            compiler_params=pltpu.CompilerParams(
                dimension_semantics=("parallel", "arbitrary"),
                vmem_limit_bytes=vmem_limit,
            ),
        )(feats_p, feats_sT, labels_col, labels_s_row)

    # Cross-row mean in JAX; padded rows are sliced away before the sum.
    return jnp.sum(out[:B, 0]) / jnp.float32(B)


# ----------------------------------------------------------------------------
# Pure-JAX reference and test harness
# ----------------------------------------------------------------------------
def _reference(feats, feats_s, labels, labels_s, *, intra_topk, temp_lp_loss):
    feats_s_flat = feats_s.reshape(-1, feats_s.shape[-1])
    sim = jnp.matmul(feats, feats_s_flat.T,
                     precision=jax.lax.Precision.HIGHEST) / temp_lp_loss
    e = jnp.exp(sim)
    is_pos = labels[:, None] == labels_s[None, :]
    pos = jnp.min(jnp.where(is_pos, e, jnp.inf), axis=-1)
    neg = jnp.sum(jnp.where(is_pos, 0.0, e), axis=-1)
    loss_i = -jnp.log(pos / (pos + neg + 1e-6) + 1e-6)
    return jnp.mean(loss_i)


def _run_case(key, B, C, B_s, topk, n_ids, temp, block_b=None, block_ns=None):
    k1, k2 = jax.random.split(key)
    feats = jax.random.normal(k1, (B, C), dtype=jnp.float32)
    feats_s = jax.random.normal(k2, (B_s, topk, C), dtype=jnp.float32)
    # L2-normalize like typical ReID features (keeps exp() well-behaved).
    feats = feats / jnp.linalg.norm(feats, axis=-1, keepdims=True)
    feats_s = feats_s / jnp.linalg.norm(feats_s, axis=-1, keepdims=True)

    labels = jnp.arange(B, dtype=jnp.int32) % n_ids                        # (B,)
    labels_s = jnp.repeat(jnp.arange(B_s, dtype=jnp.int32) % n_ids, topk)  # (B_s*topk,)

    loss = criterion_lp_intra(
        feats, feats_s, labels, labels_s,
        intra_topk=topk, temp_lp_loss=temp,
        block_b=block_b, block_ns=block_ns)
    jax.block_until_ready(loss)

    ref = _reference(feats, feats_s, labels, labels_s,
                     intra_topk=topk, temp_lp_loss=temp)
    assert jnp.allclose(loss, ref, rtol=1e-3, atol=1e-3), (loss, ref)
    return loss


if __name__ == "__main__":
    key = jax.random.PRNGKey(0)
    k_a, k_b = jax.random.split(key)

    # Case 1: small shapes — exercises the RESIDENT path (support^T DMA'd
    # once, kept in VMEM), row padding, sentinel-label padded columns with
    # the static neg correction, and auto grid_b >= 2 splitting.
    _run_case(k_a, B=10, C=32, B_s=4, topk=2, n_ids=4, temp=0.05)

    # Case 2: forces the TILED path (3 B-tiles x 2 N_s-tiles) — exercises the
    # lane-wide running min/sum accumulators, pl.when init/finalize and the
    # padded-column correction on the reduction axis.
    _run_case(k_b, B=24, C=32, B_s=96, topk=2, n_ids=8, temp=0.05,
              block_b=8, block_ns=128)

    print("KERNEL_OK")
</pallas_src>

<mosaic_0001>
module attributes {stable_mosaic.version = 11 : i64} {
  func.func @kernel(%arg0: i32, %arg1: memref<8x32xf32, #tpu.memory_space<vmem>>, %arg2: memref<32x128xf32, #tpu.memory_space<vmem>>, %arg3: memref<8x1xi32, #tpu.memory_space<vmem>>, %arg4: memref<1x128xi32, #tpu.memory_space<vmem>>, %arg5: memref<8x1xf32, #tpu.memory_space<vmem>>) attributes {dimension_semantics = [#tpu.dimension_semantics<parallel>], iteration_bounds = array<i64: 2>, scalar_prefetch = 0 : i64, scratch_operands = 0 : i64, tpu.core_type = #tpu.core_type<tc>, window_params = [{transform_indices = @transform_0, window_bounds = array<i64: 8, 32>}, {pipeline_mode = #tpu.pipeline_mode<synchronous>, transform_indices = @transform_1, window_bounds = array<i64: 32, 128>}, {transform_indices = @transform_2, window_bounds = array<i64: 8, 1>}, {pipeline_mode = #tpu.pipeline_mode<synchronous>, transform_indices = @transform_3, window_bounds = array<i64: 1, 128>}, {transform_indices = @transform_4, window_bounds = array<i64: 8, 1>}]} {
    %c0 = arith.constant 0 : index
    %c0_0 = arith.constant 0 : index
    %0 = vector.load %arg1[%c0, %c0_0] : memref<8x32xf32, #tpu.memory_space<vmem>>, vector<8x32xf32>
    %c0_1 = arith.constant 0 : index
    %c0_2 = arith.constant 0 : index
    %1 = vector.load %arg2[%c0_1, %c0_2] : memref<32x128xf32, #tpu.memory_space<vmem>>, vector<32x128xf32>
    %cst = arith.constant dense<0.000000e+00> : vector<8x128xf32>
    %2 = tpu.matmul %0, %1, %cst {dimension_numbers = #tpu.dot_dimension_numbers<[1], [0], [0], [1], [0, 0, 1, 1], [], []>} : vector<8x32xf32>, vector<32x128xf32>, vector<8x128xf32> -> vector<8x128xf32>
    %cst_3 = arith.constant 2.000000e+01 : f32
    %3 = vector.broadcast %cst_3 : f32 to vector<8x128xf32>
    %4 = arith.mulf %2, %3 : vector<8x128xf32>
    %5 = math.exp %4 : vector<8x128xf32>
    %c0_4 = arith.constant 0 : index
    %c0_5 = arith.constant 0 : index
    %6 = vector.load %arg3[%c0_4, %c0_5] : memref<8x1xi32, #tpu.memory_space<vmem>>, vector<8x1xi32>
    %c0_6 = arith.constant 0 : index
    %c0_7 = arith.constant 0 : index
    %7 = vector.load %arg4[%c0_6, %c0_7] : memref<1x128xi32, #tpu.memory_space<vmem>>, vector<1x128xi32>
    %8 = vector.broadcast %6 : vector<8x1xi32> to vector<8x128xi32>
    %9 = vector.broadcast %7 : vector<1x128xi32> to vector<8x128xi32>
    %10 = arith.cmpi eq, %8, %9 : vector<8x128xi32>
    %cst_8 = arith.constant 0x7F800000 : f32
    %11 = vector.broadcast %cst_8 : f32 to vector<8x128xf32>
    %12 = arith.select %10, %5, %11 : vector<8x128xi1>, vector<8x128xf32>
    %cst_9 = arith.constant dense<0x7F800000> : vector<8xf32>
    %13 = vector.multi_reduction <minimumf>, %12, %cst_9 [1] : vector<8x128xf32> to vector<8xf32>
    %14 = vector.shape_cast %13 : vector<8xf32> to vector<8x1xf32>
    %cst_10 = arith.constant 0.000000e+00 : f32
    %15 = vector.broadcast %cst_10 : f32 to vector<8x128xf32>
    %16 = arith.select %10, %15, %5 : vector<8x128xi1>, vector<8x128xf32>
    %cst_11 = arith.constant dense<0.000000e+00> : vector<8xf32>
    %17 = vector.multi_reduction <add>, %16, %cst_11 [1] : vector<8x128xf32> to vector<8xf32>
    %18 = vector.shape_cast %17 : vector<8xf32> to vector<8x1xf32>
    %cst_12 = arith.constant 1.200000e+02 : f32
    %19 = vector.broadcast %cst_12 : f32 to vector<8x1xf32>
    %20 = arith.subf %18, %19 : vector<8x1xf32>
    %21 = arith.addf %14, %20 : vector<8x1xf32>
    %cst_13 = arith.constant 9.99999997E-7 : f32
    %22 = vector.broadcast %cst_13 : f32 to vector<8x1xf32>
    %23 = arith.addf %21, %22 : vector<8x1xf32>
    %24 = arith.divf %14, %23 : vector<8x1xf32>
    %cst_14 = arith.constant 9.99999997E-7 : f32
    %25 = vector.broadcast %cst_14 : f32 to vector<8x1xf32>
    %26 = arith.addf %24, %25 : vector<8x1xf32>
    %27 = math.log %26 : vector<8x1xf32>
    %cst_15 = arith.constant 0.000000e+00 : f32
    %28 = vector.broadcast %cst_15 : f32 to vector<8x1xf32>
    %29 = arith.subf %28, %27 : vector<8x1xf32>
    %c0_16 = arith.constant 0 : index
    %c0_17 = arith.constant 0 : index
    %30 = vector.load %arg5[%c0_16, %c0_17] : memref<8x1xf32, #tpu.memory_space<vmem>>, vector<8x1xf32>
    tpu.vector_store %arg5[%c0_16, %c0_17], %29 {strides = array<i32>} : memref<8x1xf32, #tpu.memory_space<vmem>>, vector<8x1xf32>,
    return
  }
  func.func @transform_0(%arg0: i32) -> (i32, i32) {
    %c0_i32 = arith.constant 0 : i32
    %c0_i32_0 = arith.constant 0 : i32
    return %arg0, %c0_i32 : i32, i32
  }
  func.func @transform_1(%arg0: i32) -> (i32, i32) {
    %c0_i32 = arith.constant 0 : i32
    %c0_i32_0 = arith.constant 0 : i32
    %c0_i32_1 = arith.constant 0 : i32
    return %c0_i32, %c0_i32_0 : i32, i32
  }
  func.func @transform_2(%arg0: i32) -> (i32, i32) {
    %c0_i32 = arith.constant 0 : i32
    %c0_i32_0 = arith.constant 0 : i32
    return %arg0, %c0_i32 : i32, i32
  }
  func.func @transform_3(%arg0: i32) -> (i32, i32) {
    %c0_i32 = arith.constant 0 : i32
    %c0_i32_0 = arith.constant 0 : i32
    %c0_i32_1 = arith.constant 0 : i32
    return %c0_i32, %c0_i32_0 : i32, i32
  }
  func.func @transform_4(%arg0: i32) -> (i32, i32) {
    %c0_i32 = arith.constant 0 : i32
    %c0_i32_0 = arith.constant 0 : i32
    return %arg0, %c0_i32 : i32, i32
  }
}

</mosaic_0001>

<bundles_post_ra>
// kernel: tpu_custom_call.1
= control target key start
LH: loop header
LB: loop body
LE: loop exit
PB: predicated region body
PF: predicated region fallthrough
CT: control target
= control target key end

     0   :  { %9 = vsyncpa [#allocation3], 0  ;;  %s552_s15 = smov 0   ;;  %s619_s0 = inlined_call_operand.vmem [shape: f32[16,32], index: 0, kind: input, shape index: {}]   ;;  %s620_s1 = inlined_call_operand.hbm [shape: f32[32,128], index: 1, kind: input, shape index: {}]   ;;  %s621_s2 = inlined_call_operand.vmem [shape: s32[16,1], index: 2, kind: input, shape index: {}]   ;;  %s622_s3 = inlined_call_operand.vmem [shape: s32[1,128], index: 3, kind: input, shape index: {}]   ;;  %s623_s4 = inlined_call_operand.vmem [shape: f32[16,1], index: 4, kind: output, shape index: {}]  }
   0x1 LB: > { %s558_s16 = sadd.s32 4294967295, %s518_s15   ;;  %p413_p0 = scmp.ge.s32.totalorder %s518_s15, 1  ;;  %s518_s15 = sphi %s552_s15, %s15_s15  }
   0x2   : > { %p140_p1 = scmp.lt.s32.totalorder %s518_s15, 3  ;;  %s520_s17 = smov [#allocation2]  }
   0x3   : > { %s152_s18 = sshll.u32 %s520_s17, 4  ;;  %p624_p3 = scmp.eq.s32.totalorder %s558_s16, 0  ;;  %s153_s18 = int_to_ptr.vmem [resolvable:$true] %s152_s18 }
   0x4   : > { %p562_p2 = pnand %p413_p0, %p140_p1  ;;  %s480_s23 = scalar_lea.hbm %s620_s1, 512 }
   0x5   : > { %p481_p6 = scmp.ne.s32.totalorder %s620_s1, %s480_s23  ;;  %p487_p10 = scmp.lt.u32.totalorder %s480_s23, %s620_s1 }
   0x6   : > { %s626_s19 = scalar_select %p562_p2, 1, 0 }
   0x7   : > { %p452_p4 = pneg %p562_p2 }
   0x9   : > { %p571_p5 = pnand %p624_p3, %p452_p4 }
   0xb   : > { %p482_p7 = pneg %p571_p5 }
   0xd   : > { %p483_p8 = pnand %p482_p7, %p481_p6 }
   0xf   : > { %p484_p9 = pneg %p483_p8 }
  0x11   : > { %p489_p11 = pnand %p487_p10, %p484_p9 }
  0x13   : > { %492 = shalt.err (!%p489_p11)
}
  0x14   : > { %s493_s28 = scalar_lea.vmem %s153_s18, 512  ;;  %p501_p1 = scmp.lt.s32.totalorder %s153_s18, %s153_s18 }
  0x15   : > { %p494_p12 = scmp.ne.s32.totalorder %s153_s18, %s493_s28  ;;  %p502_p4 = scmp.lt.s32.totalorder %s493_s28, %s493_s28 }
  0x17   : > { %p496_p13 = pnand %p494_p12, %p482_p7  ;;  %p503_p3 = por %p502_p4, %p501_p1 }
  0x19   : > { %p497_p0 = pneg %p496_p13 }
  0x1b   : > { %p504_p2 = pnand %p503_p3, %p497_p0 }
  0x1d   : > { %507 = shalt.err (!%p504_p2)
}
  0x1e   : > { %s521_s29 = smov 128   ;;  %s522_s30 = smov 8  }
  0x1f   : > { %455 = dma.hbm_to_vmem [thread:$0]  (!%p571_p5), %s620_s1, 512, %s153_s18, [#allocation3], %s521_s29, %s521_s29, %s522_s30  }
  0x20   : > { %p628_p6 = scmp.ne.s32.totalorder %s626_s19, 0 }
  0x21   : > { %p629_p8 = scmp.eq.s32.totalorder (!%p628_p6), %s558_s16, 0 }
  0x22   : > { %185 = sbr.rel (%p628_p6) target bundleno = 460 (0x1cc), region = 36 }
  0x29   : > { %513 = dma.done.wait (%p629_p8), [#allocation3], 512   ;;  %p630_p7 = pmov %p629_p8 }
  0x2a   : > { %p213_p2 = scmp.lt.s32.totalorder %s558_s16, 1  ;;  %v523_v0 = vmov 0.0|0.0   ;;  %vm524_vm0 = vmmov 0   ;;  %v525_v1 = vmov 0.0   ;;  %v526_v2 = vmov 0   ;;  %v226_v3 = vld [vmem:[#allocation2] sm:$0xff] }
  0x2b   : > { %515 = vsyncadd (%p630_p7), [#allocation3], 4294966784  ;;  %442 = vmatprep.subr.bf16.mxu0 %v523_v0  ;;  %439 = vmatprep.mubr.msk.f32.mxu0 %vm524_vm0, %v525_v1  ;;  %v227_v4 = vld [vmem:[#allocation2 + $0x8] sm:$0xff]  ;;  %v228_v5 = vld [vmem:[#allocation2 + $0x10] sm:$0xff]  ;;  %vm230_vm1 = vcmask 261120   ;;  %vm332_vm3 = vcmask 7168  }
  0x2c   : > { %s632_s16 = smov (!%p213_p2, %s558_s16), 1  ;;  %473 = vset.pattern.permute.xlu0 %v526_v2  ;;  %v443_v6 = vpack.c.bf16 %v227_v4, %v226_v3  ;;  %v229_v7 = vld [vmem:[#allocation2 + $0x18] sm:$0xff]  ;;  %v422_v15 = vld [vmem:[%s622_s3] ss:$0 sm:$0xff] }
  0x2d   : > { %s599_s7 = sshll.u32 %s632_s16, 3  ;;  %v446_v9 = vpack.c.bf16 %v229_v7, %v228_v5 }
  0x2e   : > { %s220_s10 = scalar_lea.vmem %s621_s2, %s599_s7  ;;  %444 = vmatpush3.bf16.msra.mxu0 %v443_v6  ;;  %s216_s13 = scalar_lea.vmem %s619_s0, %s599_s7 }
  0x2f   : > { %v307_v8 = vld [vmem:[%s220_s10] sm:$0xff]  ;;  %445 = vmatprep.subr.bf16.mxu0 %v523_v0  ;;  %s224_s19 = scalar_lea.vmem %s623_s4, %s599_s7 }
  0x30   : > { %310 = vperm.xlu0 %473, %v307_v8   ;;  %v225_v10 = vld [vmem:[%s216_s13] sm:$0xff] }
  0x32   : > { %447 = vmatpush3.bf16.msra.mxu0 %v446_v9 }
  0x35   : > { %440 = vmatmul.mubr.msk.f32.vlgmr.msra.gmra.mrb[0].mxu0 %vm230_vm1, %v225_v10 }
  0xaf   : > { %v311_v16 = vpop.permute.xlu0 %310 }
  0xb0   : > { %vm316_vm2 = vcmp.eq.s32.totalorder %v311_v16, %v422_v15 }
 0x108   : > { %v300_v11 = vpop.f32.mrb[0].mxu0 }
 0x109   : > { %v304_v12 = vmul.f32 20.0, %v300_v11  ;;  %v441_v13 = vpop.f32.mrb[1].mxu0 }
 0x10b   : > { %v305_v14 = vmul.f32 1.442695, %v304_v12 }
 0x10d   : > { %474 = vpow2.f32 %v305_v14 }
 0x117   : > { %v475_v17 = vpop.eup %474 }
 0x118   : > { %v320_v18 = vsel %vm316_vm2, 0.0, %v475_v17  ;;  %v317_v19 = vsel %vm316_vm2, %v475_v17, inf }
 0x119   : > { %321 = vadd.xlane.f32.xlu0 %v320_v18  ;;  %318 = vmin.xlane.f32.xlu1 %v317_v19 }
 0x1a6   : > { %v322_v20 = vpop.xlane.xlu0 %321  ;;  %v319_v22 = vpop.xlane.xlu1 %318 }
 0x1a7   : > { %v423_v21 = vadd.f32 -120.0, %v322_v20 }
 0x1a9   : > { %v324_v23 = vadd.f32 %v423_v21, %v319_v22 }
 0x1ab   : > { %v325_v24 = vadd.f32 1e-06, %v324_v23 }
 0x1ad   : > { %476 = vrcp.f32 %v325_v24 }
 0x1b7   : > { %v477_v25 = vpop.eup %476 }
 0x1b8   : > { %v327_v26 = vmul.f32 %v477_v25, %v319_v22 }
 0x1ba   : > { %v328_v27 = vadd.f32 1e-06, %v327_v26 }
 0x1bc   : > { %478 = vlog2.f32 %v328_v27 }
 0x1c6   : > { %v479_v28 = vpop.eup %478 }
 0x1c7   : > { %v330_v29 = vmul.f32 0.6931472, %v479_v28 }
 0x1c9   : > { %v331_v30 = vsub.f32 0.0, %v330_v29 }
 0x1cb   : > { %333 = vst.msk [vmem:[%s224_s19] sm:$0xff] %vm332_vm3, %v331_v30 }
 0x1cc PF: > { %s15_s15 = sadd.s32 1, %s518_s15  }
 0x1cd   : > { %p12_p3 = scmp.ge.s32.totalorder %s15_s15, 4  }
 0x1cf   :  { %14 = sbr.rel (!%p12_p3) target bundleno = 1 (0x1), region = 74 }
 0x1d6   :  { %353 = vsyncpa [#allocation3], 1 }
 0x1d7   :  { %355 = vsyncpa [#allocation3 + $0x1], 1 }

</bundles_post_ra>
